<compile_context>
chip_gen: v5e
topology: v5e:2x2
jax: 0.10.0
libtpu: 0.0.40
codegen_flags: <defaults>
</compile_context>

<pallas_src>
import functools

import jax
import jax.numpy as jnp
from jax import lax
from jax.experimental import pallas as pl
from jax.experimental.pallas import tpu as pltpu


def _round_up(x, m):
    return (x + m - 1) // m * m


def _cdiv(a, b):
    return -(-a // b)


def _vmem_limit_bytes():
    """Generation-aware VMEM limit: ~80% of physical, capped at 112 MiB."""
    default = 48 * 1024 * 1024
    try:
        cap = getattr(pltpu.get_tpu_info(), "vmem_capacity_bytes", None)
    except Exception:
        return default
    if not cap:
        return default
    return max(32 * 1024 * 1024, min(int(cap * 0.8), 112 * 1024 * 1024))


def _elman_block_kernel(x_ref, h0_ref, wih_ref, whh_ref, wout_ref,
                        out_ref, rnn_ref, h1_ref, *, tt, t_real, has_tail):
    """One grid step = TT timesteps of the recurrence for one batch block.

    x_ref    : (TT, Bb, Ip)
    h0_ref   : (1,  Bb, Hp)   initial hidden state for this batch block
    wih_ref  : (Ip, Hp)       W_ih^T  (single-buffered, constant block index)
    whh_ref  : (Hp, Hp)       W_hh^T
    wout_ref : (Hp, Op)       W_out^T
    out_ref  : (TT, Bb, Op)   projected output block
    rnn_ref  : (TT, Bb, Hp)   per-step hidden states (also used to stage x@W_ih^T)
    h1_ref   : (1,  Bb, Hp)   resident carry / final hidden state
    """
    tb = pl.program_id(1)  # time-block index (sequential / "arbitrary")

    # Initialize the resident hidden-state carry from h0 at the start of each
    # batch block's time loop.
    @pl.when(tb == 0)
    def _():
        h1_ref[...] = h0_ref[...]

    tt_, bsz, ip = x_ref.shape
    hp = whh_ref.shape[0]
    op = out_ref.shape[-1]

    # (1) Hoisted input projection: one large MXU matmul for the whole block,
    # staged into the rnn output block (each step overwrites its row with h_t).
    x2d = x_ref[...].reshape(tt * bsz, ip)
    xw = jnp.dot(x2d, wih_ref[...], preferred_element_type=jnp.float32)
    rnn_ref[...] = xw.reshape(tt, bsz, hp).astype(rnn_ref.dtype)

    w_hh = whh_ref[...]                 # load once; reused across the time loop
    valid = t_real - tb * tt            # number of real timesteps in this block

    # TODO(synk): for very large Hp, hold W_hh in the MXU across the unrolled
    # steps via pltpu.matmul_push_rhs/matmul_acc_lhs/matmul_pop.
    def step(i, h):
        h_new = jnp.tanh(rnn_ref[i] +
                         jnp.dot(h, w_hh, preferred_element_type=jnp.float32))
        rnn_ref[i] = h_new.astype(rnn_ref.dtype)
        if has_tail:
            # Zero-padded tail steps must not advance the carry.
            return jnp.where(i < valid, h_new, h)
        return h_new

    unroll = True if tt <= 32 else 8
    h_final = lax.fori_loop(0, tt, step, h1_ref[0].astype(jnp.float32),
                            unroll=unroll)
    h1_ref[0] = h_final.astype(h1_ref.dtype)

    # (2) Fused output projection epilogue: y = h_block @ W_out^T. Off the
    # per-step critical path; avoids an HBM round trip of rnn_out.
    y = jnp.dot(rnn_ref[...].reshape(tt * bsz, hp), wout_ref[...],
                preferred_element_type=jnp.float32)
    out_ref[...] = y.reshape(tt, bsz, op).astype(out_ref.dtype)


def elman_rnn_forward(x, h0, w_ih, w_hh, w_out, *, time_block=None):
    """x: (T,B,I), h0: (1,B,H), w_ih: (H,I), w_hh: (H,H), w_out: (O,H)."""
    T, B, I = x.shape
    H = w_ih.shape[0]
    O = w_out.shape[0]
    dtype = x.dtype

    # ---- Padded / blocked sizes (lane-dense, sublane-aligned). ----
    if B <= 8:
        Bp, BB = 8, 8                       # single batch block
    else:
        Bp = _round_up(B, 16)
        BB = Bp // 2                        # two batch blocks -> megacore on v7x
    n_bblocks = Bp // BB
    Ip = _round_up(I, 128)
    Hp = _round_up(H, 128)
    Op = _round_up(O, 128)

    # Time block: aim for TT*BB >= 256 LHS rows (fills 2x256 MXUs on v6e/v7x)
    # while not exceeding T (no divisor requirement; tail is masked).
    if time_block is None:
        target = max(16, _cdiv(256, BB))
        time_block = min(target, T)
    TT = int(time_block)
    n_tblocks = _cdiv(T, TT)
    T_pad = n_tblocks * TT
    has_tail = T_pad != T

    # ---- Zero-padded inputs / weights (padding is exact, see header). ----
    xp = jnp.zeros((T_pad, Bp, Ip), dtype).at[:T, :B, :I].set(x)
    h0p = jnp.zeros((1, Bp, Hp), dtype).at[:, :B, :H].set(h0)
    wih_t = jnp.zeros((Ip, Hp), dtype).at[:I, :H].set(w_ih.T)
    whh_t = jnp.zeros((Hp, Hp), dtype).at[:H, :H].set(w_hh.T)
    wout_t = jnp.zeros((Hp, Op), dtype).at[:H, :O].set(w_out.T)

    vmem_limit = _vmem_limit_bytes()
    kernel = functools.partial(_elman_block_kernel, tt=TT, t_real=T,
                               has_tail=has_tail)

    out_p, rnn_p, h1_p = pl.pallas_call(
        kernel,
        out_shape=(
            jax.ShapeDtypeStruct((T_pad, Bp, Op), dtype),   # output (padded)
            jax.ShapeDtypeStruct((T_pad, Bp, Hp), dtype),   # rnn_out (padded)
            jax.ShapeDtypeStruct((1, Bp, Hp), dtype),       # hidden1 (padded)
        ),
        grid_spec=pltpu.PrefetchScalarGridSpec(
            num_scalar_prefetch=0,
            grid=(n_bblocks, n_tblocks),        # batch parallel, time sequential
            in_specs=[
                pl.BlockSpec((TT, BB, Ip), lambda bb, tb: (tb, bb, 0)),   # x
                pl.BlockSpec((1, BB, Hp), lambda bb, tb: (0, bb, 0)),     # h0
                # Constant-index weights: single-buffered to halve VMEM use.
                pl.BlockSpec((Ip, Hp), lambda bb, tb: (0, 0),
                             pipeline_mode=pl.Buffered(1)),               # W_ih^T
                pl.BlockSpec((Hp, Hp), lambda bb, tb: (0, 0),
                             pipeline_mode=pl.Buffered(1)),               # W_hh^T
                pl.BlockSpec((Hp, Op), lambda bb, tb: (0, 0),
                             pipeline_mode=pl.Buffered(1)),               # W_out^T
            ],
            out_specs=[
                pl.BlockSpec((TT, BB, Op), lambda bb, tb: (tb, bb, 0)),   # output
                pl.BlockSpec((TT, BB, Hp), lambda bb, tb: (tb, bb, 0)),   # rnn_out
                pl.BlockSpec((1, BB, Hp), lambda bb, tb: (0, bb, 0)),     # carry
            ],
        ),
        compiler_params=pltpu.CompilerParams(
            dimension_semantics=("parallel", "arbitrary"),
            vmem_limit_bytes=vmem_limit,
        ),
    )(xp, h0p, wih_t, whh_t, wout_t)

    # Strip padding (plain XLA slices outside the kernel).
    output = out_p[:T, :B, :O]
    rnn_out = rnn_p[:T, :B, :H]
    hidden1 = h1_p[:, :B, :H]
    return output, hidden1, rnn_out


def elman_rnn_reference(x, h0, w_ih, w_hh, w_out):
    """Pure-JAX reference (matches torch.nn.RNN + Linear, no bias)."""
    def step(h, x_t):
        h_new = jnp.tanh(x_t @ w_ih.T + h @ w_hh.T)
        return h_new, h_new
    h_last, rnn_out = jax.lax.scan(step, h0[0], x)
    output = rnn_out @ w_out.T
    return output, h_last[None], rnn_out


def _run_case(key, T, B, I, H, O, time_block=None):
    k_x, k_h, k_wih, k_whh, k_wout = jax.random.split(key, 5)
    bound = 1.0 / jnp.sqrt(jnp.float32(H))   # PyTorch-style init
    w_ih = jax.random.uniform(k_wih, (H, I), jnp.float32, -bound, bound)
    w_hh = jax.random.uniform(k_whh, (H, H), jnp.float32, -bound, bound)
    w_out = jax.random.uniform(k_wout, (O, H), jnp.float32, -bound, bound)
    x = jax.random.normal(k_x, (T, B, I), jnp.float32)
    h0 = jax.random.normal(k_h, (1, B, H), jnp.float32)

    output, hidden1, rnn_out = elman_rnn_forward(
        x, h0, w_ih, w_hh, w_out, time_block=time_block)
    jax.block_until_ready((output, hidden1, rnn_out))

    ref_out, ref_h1, ref_rnn = elman_rnn_reference(x, h0, w_ih, w_hh, w_out)
    assert jnp.allclose(output, ref_out, atol=1e-5, rtol=1e-5)
    assert jnp.allclose(hidden1, ref_h1, atol=1e-5, rtol=1e-5)
    assert jnp.allclose(rnn_out, ref_rnn, atol=1e-5, rtol=1e-5)
    return output


if __name__ == "__main__":
    key = jax.random.PRNGKey(0)
    k1, k2 = jax.random.split(key)

    # Main case (matches the module's implied small shapes): T=8, B=2, I=16,
    # H=32, O=8; single time block, single batch block.
    _run_case(k1, T=8, B=2, I=16, H=32, O=8)

    # Exercise the general paths: multiple time blocks with a masked tail
    # (T=10, TT=4) and two batch blocks (B=20 -> Bp=32, BB=16).
    _run_case(k2, T=10, B=20, I=16, H=32, O=8, time_block=4)

    print("KERNEL_OK")
</pallas_src>

<mosaic_0001>
module attributes {stable_mosaic.version = 11 : i64} {
  func.func @_elman_block_kernel(%arg0: i32, %arg1: i32, %arg2: memref<8x8x128xf32, #tpu.memory_space<vmem>>, %arg3: memref<1x8x128xf32, #tpu.memory_space<vmem>>, %arg4: memref<128x128xf32, #tpu.memory_space<vmem>>, %arg5: memref<128x128xf32, #tpu.memory_space<vmem>>, %arg6: memref<128x128xf32, #tpu.memory_space<vmem>>, %arg7: memref<8x8x128xf32, #tpu.memory_space<vmem>>, %arg8: memref<8x8x128xf32, #tpu.memory_space<vmem>>, %arg9: memref<1x8x128xf32, #tpu.memory_space<vmem>>) attributes {dimension_semantics = [#tpu.dimension_semantics<parallel>, #tpu.dimension_semantics<arbitrary>], iteration_bounds = array<i64: 1, 1>, scalar_prefetch = 0 : i64, scratch_operands = 0 : i64, tpu.core_type = #tpu.core_type<tc>, window_params = [{transform_indices = @transform_0, window_bounds = array<i64: 8, 8, 128>}, {transform_indices = @transform_1, window_bounds = array<i64: 1, 8, 128>}, {pipeline_mode = #tpu.pipeline_mode<synchronous>, transform_indices = @transform_2, window_bounds = array<i64: 128, 128>}, {pipeline_mode = #tpu.pipeline_mode<synchronous>, transform_indices = @transform_3, window_bounds = array<i64: 128, 128>}, {pipeline_mode = #tpu.pipeline_mode<synchronous>, transform_indices = @transform_4, window_bounds = array<i64: 128, 128>}, {transform_indices = @transform_5, window_bounds = array<i64: 8, 8, 128>}, {transform_indices = @transform_6, window_bounds = array<i64: 8, 8, 128>}, {transform_indices = @transform_7, window_bounds = array<i64: 1, 8, 128>}]} {
    %c0_i32 = arith.constant 0 : i32
    %0 = arith.cmpi eq, %arg1, %c0_i32 : i32
    %1 = arith.extui %0 : i1 to i32
    %c0_i32_0 = arith.constant 0 : i32
    %2 = arith.cmpi ne, %1, %c0_i32_0 : i32
    scf.if %2 {
      %c0_66 = arith.constant 0 : index
      %c0_67 = arith.constant 0 : index
      %c0_68 = arith.constant 0 : index
      %101 = vector.load %arg3[%c0_66, %c0_67, %c0_68] : memref<1x8x128xf32, #tpu.memory_space<vmem>>, vector<1x8x128xf32>
      %c0_69 = arith.constant 0 : index
      %c0_70 = arith.constant 0 : index
      %c0_71 = arith.constant 0 : index
      %102 = vector.load %arg9[%c0_69, %c0_70, %c0_71] : memref<1x8x128xf32, #tpu.memory_space<vmem>>, vector<1x8x128xf32>
      tpu.vector_store %arg9[%c0_69, %c0_70, %c0_71], %101 {strides = array<i32>} : memref<1x8x128xf32, #tpu.memory_space<vmem>>, vector<1x8x128xf32>,
    } else {
    }
    %c0 = arith.constant 0 : index
    %c0_1 = arith.constant 0 : index
    %c0_2 = arith.constant 0 : index
    %3 = vector.load %arg2[%c0, %c0_1, %c0_2] : memref<8x8x128xf32, #tpu.memory_space<vmem>>, vector<8x8x128xf32>
    %4 = vector.shape_cast %3 : vector<8x8x128xf32> to vector<64x128xf32>
    %c0_3 = arith.constant 0 : index
    %c0_4 = arith.constant 0 : index
    %5 = vector.load %arg4[%c0_3, %c0_4] : memref<128x128xf32, #tpu.memory_space<vmem>>, vector<128x128xf32>
    %cst = arith.constant dense<0.000000e+00> : vector<64x128xf32>
    %6 = tpu.matmul %4, %5, %cst {dimension_numbers = #tpu.dot_dimension_numbers<[1], [0], [0], [1], [0, 0, 1, 1], [], []>} : vector<64x128xf32>, vector<128x128xf32>, vector<64x128xf32> -> vector<64x128xf32>
    %7 = vector.shape_cast %6 : vector<64x128xf32> to vector<8x8x128xf32>
    %c0_5 = arith.constant 0 : index
    %c0_6 = arith.constant 0 : index
    %c0_7 = arith.constant 0 : index
    %8 = vector.load %arg8[%c0_5, %c0_6, %c0_7] : memref<8x8x128xf32, #tpu.memory_space<vmem>>, vector<8x8x128xf32>
    tpu.vector_store %arg8[%c0_5, %c0_6, %c0_7], %7 {strides = array<i32>} : memref<8x8x128xf32, #tpu.memory_space<vmem>>, vector<8x8x128xf32>,
    %c0_8 = arith.constant 0 : index
    %c0_9 = arith.constant 0 : index
    %9 = vector.load %arg5[%c0_8, %c0_9] : memref<128x128xf32, #tpu.memory_space<vmem>>, vector<128x128xf32>
    %c0_10 = arith.constant 0 : index
    %c0_11 = arith.constant 0 : index
    %c0_12 = arith.constant 0 : index
    %10 = vector.load %arg9[%c0_10, %c0_11, %c0_12] : memref<1x8x128xf32, #tpu.memory_space<vmem>>, vector<1x8x128xf32>
    %11 = vector.shape_cast %10 : vector<1x8x128xf32> to vector<8x128xf32>
    %c0_i32_13 = arith.constant 0 : i32
    %12 = arith.index_cast %c0_i32_13 : i32 to index
    %c0_14 = arith.constant 0 : index
    %c0_15 = arith.constant 0 : index
    %13 = vector.load %arg8[%12, %c0_14, %c0_15] : memref<8x8x128xf32, #tpu.memory_space<vmem>>, vector<1x8x128xf32>
    %14 = vector.shape_cast %13 : vector<1x8x128xf32> to vector<8x128xf32>
    %cst_16 = arith.constant dense<0.000000e+00> : vector<8x128xf32>
    %15 = tpu.matmul %11, %9, %cst_16 {dimension_numbers = #tpu.dot_dimension_numbers<[1], [0], [0], [1], [0, 0, 1, 1], [], []>} : vector<8x128xf32>, vector<128x128xf32>, vector<8x128xf32> -> vector<8x128xf32>
    %16 = arith.addf %14, %15 : vector<8x128xf32>
    %17 = math.tanh %16 : vector<8x128xf32>
    %18 = arith.index_cast %c0_i32_13 : i32 to index
    %c0_17 = arith.constant 0 : index
    %c0_18 = arith.constant 0 : index
    %19 = vector.load %arg8[%18, %c0_17, %c0_18] : memref<8x8x128xf32, #tpu.memory_space<vmem>>, vector<1x8x128xf32>
    %20 = vector.shape_cast %19 : vector<1x8x128xf32> to vector<8x128xf32>
    %21 = vector.shape_cast %17 : vector<8x128xf32> to vector<1x8x128xf32>
    tpu.vector_store %arg8[%18, %c0_17, %c0_18], %21 {strides = array<i32>} : memref<8x8x128xf32, #tpu.memory_space<vmem>>, vector<1x8x128xf32>,
    %c1_i32 = arith.constant 1 : i32
    %22 = arith.index_cast %c1_i32 : i32 to index
    %c0_19 = arith.constant 0 : index
    %c0_20 = arith.constant 0 : index
    %23 = vector.load %arg8[%22, %c0_19, %c0_20] : memref<8x8x128xf32, #tpu.memory_space<vmem>>, vector<1x8x128xf32>
    %24 = vector.shape_cast %23 : vector<1x8x128xf32> to vector<8x128xf32>
    %cst_21 = arith.constant dense<0.000000e+00> : vector<8x128xf32>
    %25 = tpu.matmul %17, %9, %cst_21 {dimension_numbers = #tpu.dot_dimension_numbers<[1], [0], [0], [1], [0, 0, 1, 1], [], []>} : vector<8x128xf32>, vector<128x128xf32>, vector<8x128xf32> -> vector<8x128xf32>
    %26 = arith.addf %24, %25 : vector<8x128xf32>
    %27 = math.tanh %26 : vector<8x128xf32>
    %28 = arith.index_cast %c1_i32 : i32 to index
    %c0_22 = arith.constant 0 : index
    %c0_23 = arith.constant 0 : index
    %29 = vector.load %arg8[%28, %c0_22, %c0_23] : memref<8x8x128xf32, #tpu.memory_space<vmem>>, vector<1x8x128xf32>
    %30 = vector.shape_cast %29 : vector<1x8x128xf32> to vector<8x128xf32>
    %31 = vector.shape_cast %27 : vector<8x128xf32> to vector<1x8x128xf32>
    tpu.vector_store %arg8[%28, %c0_22, %c0_23], %31 {strides = array<i32>} : memref<8x8x128xf32, #tpu.memory_space<vmem>>, vector<1x8x128xf32>,
    %c2_i32 = arith.constant 2 : i32
    %32 = arith.index_cast %c2_i32 : i32 to index
    %c0_24 = arith.constant 0 : index
    %c0_25 = arith.constant 0 : index
    %33 = vector.load %arg8[%32, %c0_24, %c0_25] : memref<8x8x128xf32, #tpu.memory_space<vmem>>, vector<1x8x128xf32>
    %34 = vector.shape_cast %33 : vector<1x8x128xf32> to vector<8x128xf32>
    %cst_26 = arith.constant dense<0.000000e+00> : vector<8x128xf32>
    %35 = tpu.matmul %27, %9, %cst_26 {dimension_numbers = #tpu.dot_dimension_numbers<[1], [0], [0], [1], [0, 0, 1, 1], [], []>} : vector<8x128xf32>, vector<128x128xf32>, vector<8x128xf32> -> vector<8x128xf32>
    %36 = arith.addf %34, %35 : vector<8x128xf32>
    %37 = math.tanh %36 : vector<8x128xf32>
    %38 = arith.index_cast %c2_i32 : i32 to index
    %c0_27 = arith.constant 0 : index
    %c0_28 = arith.constant 0 : index
    %39 = vector.load %arg8[%38, %c0_27, %c0_28] : memref<8x8x128xf32, #tpu.memory_space<vmem>>, vector<1x8x128xf32>
    %40 = vector.shape_cast %39 : vector<1x8x128xf32> to vector<8x128xf32>
    %41 = vector.shape_cast %37 : vector<8x128xf32> to vector<1x8x128xf32>
    tpu.vector_store %arg8[%38, %c0_27, %c0_28], %41 {strides = array<i32>} : memref<8x8x128xf32, #tpu.memory_space<vmem>>, vector<1x8x128xf32>,
    %c3_i32 = arith.constant 3 : i32
    %42 = arith.index_cast %c3_i32 : i32 to index
    %c0_29 = arith.constant 0 : index
    %c0_30 = arith.constant 0 : index
    %43 = vector.load %arg8[%42, %c0_29, %c0_30] : memref<8x8x128xf32, #tpu.memory_space<vmem>>, vector<1x8x128xf32>
    %44 = vector.shape_cast %43 : vector<1x8x128xf32> to vector<8x128xf32>
    %cst_31 = arith.constant dense<0.000000e+00> : vector<8x128xf32>
    %45 = tpu.matmul %37, %9, %cst_31 {dimension_numbers = #tpu.dot_dimension_numbers<[1], [0], [0], [1], [0, 0, 1, 1], [], []>} : vector<8x128xf32>, vector<128x128xf32>, vector<8x128xf32> -> vector<8x128xf32>
    %46 = arith.addf %44, %45 : vector<8x128xf32>
    %47 = math.tanh %46 : vector<8x128xf32>
    %48 = arith.index_cast %c3_i32 : i32 to index
    %c0_32 = arith.constant 0 : index
    %c0_33 = arith.constant 0 : index
    %49 = vector.load %arg8[%48, %c0_32, %c0_33] : memref<8x8x128xf32, #tpu.memory_space<vmem>>, vector<1x8x128xf32>
    %50 = vector.shape_cast %49 : vector<1x8x128xf32> to vector<8x128xf32>
    %51 = vector.shape_cast %47 : vector<8x128xf32> to vector<1x8x128xf32>
    tpu.vector_store %arg8[%48, %c0_32, %c0_33], %51 {strides = array<i32>} : memref<8x8x128xf32, #tpu.memory_space<vmem>>, vector<1x8x128xf32>,
    %c4_i32 = arith.constant 4 : i32
    %52 = arith.index_cast %c4_i32 : i32 to index
    %c0_34 = arith.constant 0 : index
    %c0_35 = arith.constant 0 : index
    %53 = vector.load %arg8[%52, %c0_34, %c0_35] : memref<8x8x128xf32, #tpu.memory_space<vmem>>, vector<1x8x128xf32>
    %54 = vector.shape_cast %53 : vector<1x8x128xf32> to vector<8x128xf32>
    %cst_36 = arith.constant dense<0.000000e+00> : vector<8x128xf32>
    %55 = tpu.matmul %47, %9, %cst_36 {dimension_numbers = #tpu.dot_dimension_numbers<[1], [0], [0], [1], [0, 0, 1, 1], [], []>} : vector<8x128xf32>, vector<128x128xf32>, vector<8x128xf32> -> vector<8x128xf32>
    %56 = arith.addf %54, %55 : vector<8x128xf32>
    %57 = math.tanh %56 : vector<8x128xf32>
    %58 = arith.index_cast %c4_i32 : i32 to index
    %c0_37 = arith.constant 0 : index
    %c0_38 = arith.constant 0 : index
    %59 = vector.load %arg8[%58, %c0_37, %c0_38] : memref<8x8x128xf32, #tpu.memory_space<vmem>>, vector<1x8x128xf32>
    %60 = vector.shape_cast %59 : vector<1x8x128xf32> to vector<8x128xf32>
    %61 = vector.shape_cast %57 : vector<8x128xf32> to vector<1x8x128xf32>
    tpu.vector_store %arg8[%58, %c0_37, %c0_38], %61 {strides = array<i32>} : memref<8x8x128xf32, #tpu.memory_space<vmem>>, vector<1x8x128xf32>,
    %c5_i32 = arith.constant 5 : i32
    %62 = arith.index_cast %c5_i32 : i32 to index
    %c0_39 = arith.constant 0 : index
    %c0_40 = arith.constant 0 : index
    %63 = vector.load %arg8[%62, %c0_39, %c0_40] : memref<8x8x128xf32, #tpu.memory_space<vmem>>, vector<1x8x128xf32>
    %64 = vector.shape_cast %63 : vector<1x8x128xf32> to vector<8x128xf32>
    %cst_41 = arith.constant dense<0.000000e+00> : vector<8x128xf32>
    %65 = tpu.matmul %57, %9, %cst_41 {dimension_numbers = #tpu.dot_dimension_numbers<[1], [0], [0], [1], [0, 0, 1, 1], [], []>} : vector<8x128xf32>, vector<128x128xf32>, vector<8x128xf32> -> vector<8x128xf32>
    %66 = arith.addf %64, %65 : vector<8x128xf32>
    %67 = math.tanh %66 : vector<8x128xf32>
    %68 = arith.index_cast %c5_i32 : i32 to index
    %c0_42 = arith.constant 0 : index
    %c0_43 = arith.constant 0 : index
    %69 = vector.load %arg8[%68, %c0_42, %c0_43] : memref<8x8x128xf32, #tpu.memory_space<vmem>>, vector<1x8x128xf32>
    %70 = vector.shape_cast %69 : vector<1x8x128xf32> to vector<8x128xf32>
    %71 = vector.shape_cast %67 : vector<8x128xf32> to vector<1x8x128xf32>
    tpu.vector_store %arg8[%68, %c0_42, %c0_43], %71 {strides = array<i32>} : memref<8x8x128xf32, #tpu.memory_space<vmem>>, vector<1x8x128xf32>,
    %c6_i32 = arith.constant 6 : i32
    %72 = arith.index_cast %c6_i32 : i32 to index
    %c0_44 = arith.constant 0 : index
    %c0_45 = arith.constant 0 : index
    %73 = vector.load %arg8[%72, %c0_44, %c0_45] : memref<8x8x128xf32, #tpu.memory_space<vmem>>, vector<1x8x128xf32>
    %74 = vector.shape_cast %73 : vector<1x8x128xf32> to vector<8x128xf32>
    %cst_46 = arith.constant dense<0.000000e+00> : vector<8x128xf32>
    %75 = tpu.matmul %67, %9, %cst_46 {dimension_numbers = #tpu.dot_dimension_numbers<[1], [0], [0], [1], [0, 0, 1, 1], [], []>} : vector<8x128xf32>, vector<128x128xf32>, vector<8x128xf32> -> vector<8x128xf32>
    %76 = arith.addf %74, %75 : vector<8x128xf32>
    %77 = math.tanh %76 : vector<8x128xf32>
    %78 = arith.index_cast %c6_i32 : i32 to index
    %c0_47 = arith.constant 0 : index
    %c0_48 = arith.constant 0 : index
    %79 = vector.load %arg8[%78, %c0_47, %c0_48] : memref<8x8x128xf32, #tpu.memory_space<vmem>>, vector<1x8x128xf32>
    %80 = vector.shape_cast %79 : vector<1x8x128xf32> to vector<8x128xf32>
    %81 = vector.shape_cast %77 : vector<8x128xf32> to vector<1x8x128xf32>
    tpu.vector_store %arg8[%78, %c0_47, %c0_48], %81 {strides = array<i32>} : memref<8x8x128xf32, #tpu.memory_space<vmem>>, vector<1x8x128xf32>,
    %c7_i32 = arith.constant 7 : i32
    %82 = arith.index_cast %c7_i32 : i32 to index
    %c0_49 = arith.constant 0 : index
    %c0_50 = arith.constant 0 : index
    %83 = vector.load %arg8[%82, %c0_49, %c0_50] : memref<8x8x128xf32, #tpu.memory_space<vmem>>, vector<1x8x128xf32>
    %84 = vector.shape_cast %83 : vector<1x8x128xf32> to vector<8x128xf32>
    %cst_51 = arith.constant dense<0.000000e+00> : vector<8x128xf32>
    %85 = tpu.matmul %77, %9, %cst_51 {dimension_numbers = #tpu.dot_dimension_numbers<[1], [0], [0], [1], [0, 0, 1, 1], [], []>} : vector<8x128xf32>, vector<128x128xf32>, vector<8x128xf32> -> vector<8x128xf32>
    %86 = arith.addf %84, %85 : vector<8x128xf32>
    %87 = math.tanh %86 : vector<8x128xf32>
    %88 = arith.index_cast %c7_i32 : i32 to index
    %c0_52 = arith.constant 0 : index
    %c0_53 = arith.constant 0 : index
    %89 = vector.load %arg8[%88, %c0_52, %c0_53] : memref<8x8x128xf32, #tpu.memory_space<vmem>>, vector<1x8x128xf32>
    %90 = vector.shape_cast %89 : vector<1x8x128xf32> to vector<8x128xf32>
    %91 = vector.shape_cast %87 : vector<8x128xf32> to vector<1x8x128xf32>
    tpu.vector_store %arg8[%88, %c0_52, %c0_53], %91 {strides = array<i32>} : memref<8x8x128xf32, #tpu.memory_space<vmem>>, vector<1x8x128xf32>,
    %c8_i32 = arith.constant 8 : i32
    %c0_54 = arith.constant 0 : index
    %c0_55 = arith.constant 0 : index
    %c0_56 = arith.constant 0 : index
    %92 = vector.load %arg9[%c0_54, %c0_55, %c0_56] : memref<1x8x128xf32, #tpu.memory_space<vmem>>, vector<1x8x128xf32>
    %93 = vector.shape_cast %92 : vector<1x8x128xf32> to vector<8x128xf32>
    %94 = vector.shape_cast %87 : vector<8x128xf32> to vector<1x8x128xf32>
    tpu.vector_store %arg9[%c0_54, %c0_55, %c0_56], %94 {strides = array<i32>} : memref<1x8x128xf32, #tpu.memory_space<vmem>>, vector<1x8x128xf32>,
    %c0_57 = arith.constant 0 : index
    %c0_58 = arith.constant 0 : index
    %c0_59 = arith.constant 0 : index
    %95 = vector.load %arg8[%c0_57, %c0_58, %c0_59] : memref<8x8x128xf32, #tpu.memory_space<vmem>>, vector<8x8x128xf32>
    %96 = vector.shape_cast %95 : vector<8x8x128xf32> to vector<64x128xf32>
    %c0_60 = arith.constant 0 : index
    %c0_61 = arith.constant 0 : index
    %97 = vector.load %arg6[%c0_60, %c0_61] : memref<128x128xf32, #tpu.memory_space<vmem>>, vector<128x128xf32>
    %cst_62 = arith.constant dense<0.000000e+00> : vector<64x128xf32>
    %98 = tpu.matmul %96, %97, %cst_62 {dimension_numbers = #tpu.dot_dimension_numbers<[1], [0], [0], [1], [0, 0, 1, 1], [], []>} : vector<64x128xf32>, vector<128x128xf32>, vector<64x128xf32> -> vector<64x128xf32>
    %99 = vector.shape_cast %98 : vector<64x128xf32> to vector<8x8x128xf32>
    %c0_63 = arith.constant 0 : index
    %c0_64 = arith.constant 0 : index
    %c0_65 = arith.constant 0 : index
    %100 = vector.load %arg7[%c0_63, %c0_64, %c0_65] : memref<8x8x128xf32, #tpu.memory_space<vmem>>, vector<8x8x128xf32>
    tpu.vector_store %arg7[%c0_63, %c0_64, %c0_65], %99 {strides = array<i32>} : memref<8x8x128xf32, #tpu.memory_space<vmem>>, vector<8x8x128xf32>,
    return
  }
  func.func @transform_0(%arg0: i32, %arg1: i32) -> (i32, i32, i32) {
    %c0_i32 = arith.constant 0 : i32
    %c0_i32_0 = arith.constant 0 : i32
    return %arg1, %arg0, %c0_i32 : i32, i32, i32
  }
  func.func @transform_1(%arg0: i32, %arg1: i32) -> (i32, i32, i32) {
    %c0_i32 = arith.constant 0 : i32
    %c0_i32_0 = arith.constant 0 : i32
    %c0_i32_1 = arith.constant 0 : i32
    return %c0_i32, %arg0, %c0_i32_0 : i32, i32, i32
  }
  func.func @transform_2(%arg0: i32, %arg1: i32) -> (i32, i32) {
    %c0_i32 = arith.constant 0 : i32
    %c0_i32_0 = arith.constant 0 : i32
    %c0_i32_1 = arith.constant 0 : i32
    return %c0_i32, %c0_i32_0 : i32, i32
  }
  func.func @transform_3(%arg0: i32, %arg1: i32) -> (i32, i32) {
    %c0_i32 = arith.constant 0 : i32
    %c0_i32_0 = arith.constant 0 : i32
    %c0_i32_1 = arith.constant 0 : i32
    return %c0_i32, %c0_i32_0 : i32, i32
  }
  func.func @transform_4(%arg0: i32, %arg1: i32) -> (i32, i32) {
    %c0_i32 = arith.constant 0 : i32
    %c0_i32_0 = arith.constant 0 : i32
    %c0_i32_1 = arith.constant 0 : i32
    return %c0_i32, %c0_i32_0 : i32, i32
  }
  func.func @transform_5(%arg0: i32, %arg1: i32) -> (i32, i32, i32) {
    %c0_i32 = arith.constant 0 : i32
    %c0_i32_0 = arith.constant 0 : i32
    return %arg1, %arg0, %c0_i32 : i32, i32, i32
  }
  func.func @transform_6(%arg0: i32, %arg1: i32) -> (i32, i32, i32) {
    %c0_i32 = arith.constant 0 : i32
    %c0_i32_0 = arith.constant 0 : i32
    return %arg1, %arg0, %c0_i32 : i32, i32, i32
  }
  func.func @transform_7(%arg0: i32, %arg1: i32) -> (i32, i32, i32) {
    %c0_i32 = arith.constant 0 : i32
    %c0_i32_0 = arith.constant 0 : i32
    %c0_i32_1 = arith.constant 0 : i32
    return %c0_i32, %arg0, %c0_i32_0 : i32, i32, i32
  }
}

</mosaic_0001>

<bundles_post_ra>
// kernel: tpu_custom_call.1
= control target key start
LH: loop header
LB: loop body
LE: loop exit
PB: predicated region body
PF: predicated region fallthrough
CT: control target
= control target key end

     0   :  { %13 = vsyncpa [#allocation3], 0  ;;  %s1009_s0 = inlined_call_operand.hbm [shape: f32[8,8,128], index: 0, kind: input, shape index: {}]   ;;  %s1010_s1 = inlined_call_operand.hbm [shape: f32[1,8,128], index: 1, kind: input, shape index: {}]   ;;  %s1011_s2 = inlined_call_operand.hbm [shape: f32[128,128], index: 2, kind: input, shape index: {}]   ;;  %s1012_s3 = inlined_call_operand.hbm [shape: f32[128,128], index: 3, kind: input, shape index: {}]   ;;  %s1013_s4 = inlined_call_operand.hbm [shape: f32[128,128], index: 4, kind: input, shape index: {}]   ;;  %s1014_s5 = inlined_call_operand.hbm [shape: f32[8,8,128], index: 5, kind: output, shape index: {0}]   ;;  %s1015_s6 = inlined_call_operand.hbm [shape: f32[8,8,128], index: 6, kind: output, shape index: {1}]   ;;  %s1016_s7 = inlined_call_operand.hbm [shape: f32[1,8,128], index: 7, kind: output, shape index: {2}]  }
   0x1   :  { %14 = vsyncpa [#allocation6], 0 }
   0x2   :  { %15 = vsyncpa [#allocation9], 0 }
   0x3   :  { %16 = vsyncpa [#allocation4], 0  ;;  %s36_s26 = sshll.u32 %s1010_s1, 4  ;;  %s37_s26 = int_to_ptr.hbm [resolvable:$true] %s36_s26 }
   0x4   :  { %17 = vsyncpa [#allocation13], 0  ;;  %s752_s27 = smov [#allocation5]   ;;  %s59_s8 = sshll.u32 %s1012_s3, 4  ;;  %s60_s8 = int_to_ptr.hbm [resolvable:$true] %s59_s8 }
   0x5   :  { %s38_s28 = sshll.u32 %s752_s27, 4  ;;  %s753_s9 = smov [#allocation8]   ;;  %s39_s28 = int_to_ptr.vmem [resolvable:$true] %s38_s28 }
   0x6   :  { %41 = dma.hbm_to_vmem [thread:$0]  %s37_s26, 128, %s39_s28, [#allocation6]  }
   0x7   :  { %s61_s10 = sshll.u32 %s753_s9, 4  ;;  %s22_s13 = sshll.u32 %s1009_s0, 4  ;;  %s62_s10 = int_to_ptr.vmem [resolvable:$true] %s61_s10  ;;  %s23_s13 = int_to_ptr.hbm [resolvable:$true] %s22_s13 }
   0x8   :  { %s754_s1 = smov 128   ;;  %s755_s14 = smov 8  }
   0x9   :  { %67 = dma.hbm_to_vmem [thread:$0]  %s60_s8, 2048, %s62_s10, [#allocation9], %s754_s1, %s754_s1, %s755_s14  }
   0xa   :  { %s46_s17 = sshll.u32 %s1011_s2, 4  ;;  %s756_s3 = smov [#allocation2]   ;;  %s47_s17 = int_to_ptr.hbm [resolvable:$true] %s46_s17 }
   0xb   :  { %s24_s18 = sshll.u32 %s756_s3, 4  ;;  %s757_s0 = smov [#allocation7]   ;;  %s25_s18 = int_to_ptr.vmem [resolvable:$true] %s24_s18 }
   0xc   :  { %30 = dma.hbm_to_vmem [thread:$0]  %s23_s13, 1024, %s25_s18, [#allocation3], %s754_s1, %s754_s1, %s755_s14  }
   0xd   :  { %s48_s19 = sshll.u32 %s757_s0, 4  ;;  %s72_s22 = sshll.u32 %s1013_s4, 4  ;;  %s49_s19 = int_to_ptr.vmem [resolvable:$true] %s48_s19  ;;  %s73_s22 = int_to_ptr.hbm [resolvable:$true] %s72_s22 }
   0xe   :  { %54 = dma.hbm_to_vmem [thread:$0]  %s47_s17, 2048, %s49_s19, [#allocation6], %s754_s1, %s754_s1, %s755_s14  }
   0xf   :  { %s758_s2 = smov [#allocation10]  }
  0x10   :  { %s74_s23 = sshll.u32 %s758_s2, 4  ;;  %s75_s23 = int_to_ptr.vmem [resolvable:$true] %s74_s23 }
  0x11   :  { %80 = dma.hbm_to_vmem [thread:$0]  %s73_s22, 2048, %s75_s23, [#allocation9], %s754_s1, %s754_s1, %s755_s14  }
  0x12   :  { %742 = dma.done.wait [#allocation3], 1024  }
  0x13   :  { %743 = vsyncadd [#allocation3], 4294966272 }
  0x14   :  { %744 = dma.done.wait [#allocation6], 2176  }
  0x15   :  { %745 = vsyncadd [#allocation6], 4294965120 }
  0x16   :  { %746 = dma.done.wait [#allocation9], 4096  }
  0x17   :  { %747 = vsyncadd [#allocation9], 4294963200  ;;  %v130_v0 = vld [vmem:[#allocation7 + $0x78] sm:$0xff]  ;;  %v129_v1 = vld [vmem:[#allocation7 + $0x70] sm:$0xff]  ;;  %s759_s4 = smov [#allocation12]   ;;  %s489_s27 = sshll.u32 %s1015_s6, 4  ;;  %s490_s27 = int_to_ptr.hbm [resolvable:$true] %s489_s27 }
  0x18   :  { %131 = vmatpush.msra.mxu0 %v130_v0  ;;  %v829_v2 = vld [vmem:[#allocation8 + $0x78] sm:$0xff]  ;;  %v128_v3 = vld [vmem:[#allocation7 + $0x68] sm:$0xff]  ;;  %v832_v4 = vld [vmem:[#allocation8 + $0x70] sm:$0xff]  ;;  %s487_s24 = sshll.u32 %s759_s4, 4  ;;  %s760_s28 = smov [#allocation14]   ;;  %s488_s24 = int_to_ptr.vmem [resolvable:$true] %s487_s24 }
  0x19   :  { %198 = vmatpush.msra.mxu1 %v829_v2  ;;  %223 = vmatpush.msra.mxu3 %v829_v2  ;;  %v835_v5 = vld [vmem:[#allocation8 + $0x68] sm:$0xff]  ;;  %v127_v6 = vld [vmem:[#allocation7 + $0x60] sm:$0xff]  ;;  %v126_v8 = vld [vmem:[#allocation7 + $0x58] sm:$0xff]  ;;  %s501_s29 = sshll.u32 %s760_s28, 4  ;;  %s503_s9 = sshll.u32 %s1016_s7, 4  ;;  %s502_s29 = int_to_ptr.vmem [resolvable:$true] %s501_s29  ;;  %s504_s9 = int_to_ptr.hbm [resolvable:$true] %s503_s9 }
  0x1a   :  { %132 = vmatpush.msra.mxu0 %v129_v1  ;;  %298 = vmatpush.msra.mxu2 %v829_v2  ;;  %v840_v7 = vld [vmem:[#allocation8 + $0x60] sm:$0xff]  ;;  %v845_v9 = vld [vmem:[#allocation8 + $0x58] sm:$0xff]  ;;  %v125_v10 = vld [vmem:[#allocation7 + $0x50] sm:$0xff]  ;;  %s761_s10 = smov [#allocation11]   ;;  %s476_s6 = sshll.u32 %s1014_s5, 4  ;;  %s477_s6 = int_to_ptr.hbm [resolvable:$true] %s476_s6 }
  0x1b   :  { %199 = vmatpush.msra.mxu1 %v832_v4  ;;  %224 = vmatpush.msra.mxu3 %v832_v4  ;;  %v850_v11 = vld [vmem:[#allocation8 + $0x50] sm:$0xff]  ;;  %v124_v12 = vld [vmem:[#allocation7 + $0x48] sm:$0xff]  ;;  %v123_v14 = vld [vmem:[#allocation7 + $0x40] sm:$0xff]  ;;  %s474_s11 = sshll.u32 %s761_s10, 4  ;;  %s475_s11 = int_to_ptr.vmem [resolvable:$true] %s474_s11 }
  0x1c   :  { %133 = vmatpush.msra.mxu0 %v128_v3  ;;  %299 = vmatpush.msra.mxu2 %v832_v4  ;;  %v855_v13 = vld [vmem:[#allocation8 + $0x48] sm:$0xff]  ;;  %v860_v15 = vld [vmem:[#allocation8 + $0x40] sm:$0xff]  ;;  %v122_v16 = vld [vmem:[#allocation7 + $0x38] sm:$0xff] }
  0x1d   :  { %200 = vmatpush.msra.mxu1 %v835_v5  ;;  %225 = vmatpush.msra.mxu3 %v835_v5  ;;  %v865_v17 = vld [vmem:[#allocation8 + $0x38] sm:$0xff]  ;;  %v121_v18 = vld [vmem:[#allocation7 + $0x30] sm:$0xff]  ;;  %v120_v20 = vld [vmem:[#allocation7 + $0x28] sm:$0xff] }
  0x1e   :  { %134 = vmatpush.msra.mxu0 %v127_v6  ;;  %300 = vmatpush.msra.mxu2 %v835_v5  ;;  %v870_v19 = vld [vmem:[#allocation8 + $0x30] sm:$0xff]  ;;  %v875_v21 = vld [vmem:[#allocation8 + $0x28] sm:$0xff]  ;;  %v119_v22 = vld [vmem:[#allocation7 + $0x20] sm:$0xff] }
  0x1f   :  { %201 = vmatpush.msra.mxu1 %v840_v7  ;;  %226 = vmatpush.msra.mxu3 %v840_v7  ;;  %v880_v23 = vld [vmem:[#allocation8 + $0x20] sm:$0xff]  ;;  %v118_v24 = vld [vmem:[#allocation7 + $0x18] sm:$0xff]  ;;  %v117_v26 = vld [vmem:[#allocation7 + $0x10] sm:$0xff] }
  0x20   :  { %135 = vmatpush.msra.mxu0 %v126_v8  ;;  %301 = vmatpush.msra.mxu2 %v840_v7  ;;  %v885_v25 = vld [vmem:[#allocation8 + $0x18] sm:$0xff]  ;;  %v890_v27 = vld [vmem:[#allocation8 + $0x10] sm:$0xff]  ;;  %v116_v28 = vld [vmem:[#allocation7 + $0x8] sm:$0xff] }
  0x21   :  { %202 = vmatpush.msra.mxu1 %v845_v9  ;;  %227 = vmatpush.msra.mxu3 %v845_v9  ;;  %v895_v29 = vld [vmem:[#allocation8 + $0x8] sm:$0xff]  ;;  %v115_v30 = vld [vmem:[#allocation7] sm:$0xff]  ;;  %v107_v31 = vld [vmem:[#allocation2] sm:$0xff] }
  0x22   :  { %136 = vmatpush.msra.mxu0 %v125_v10  ;;  %302 = vmatpush.msra.mxu2 %v845_v9  ;;  %v900_v32 = vld [vmem:[#allocation8] sm:$0xff]  ;;  %v105_v33 = vld [vmem:[#allocation5] sm:$0xff]  ;;  %v109_v39 = vld [vmem:[#allocation2 + $0x10] sm:$0xff] }
  0x23   :  { %203 = vmatpush.msra.mxu1 %v850_v11  ;;  %228 = vmatpush.msra.mxu3 %v850_v11  ;;  %v108_v34 = vld [vmem:[#allocation2 + $0x8] sm:$0xff]  ;;  %v110_v44 = vld [vmem:[#allocation2 + $0x18] sm:$0xff]  ;;  %v420_v45 = vld [vmem:[#allocation10 + $0x78] sm:$0xff] }
  0x24   :  { %137 = vmatpush.msra.mxu0 %v124_v12  ;;  %303 = vmatpush.msra.mxu2 %v850_v11  ;;  %v419_v46 = vld [vmem:[#allocation10 + $0x70] sm:$0xff]  ;;  %v418_v47 = vld [vmem:[#allocation10 + $0x68] sm:$0xff]  ;;  %v417_v52 = vld [vmem:[#allocation10 + $0x60] sm:$0xff] }
  0x25   :  { %204 = vmatpush.msra.mxu1 %v855_v13  ;;  %229 = vmatpush.msra.mxu3 %v855_v13  ;;  %v416_v53 = vld [vmem:[#allocation10 + $0x58] sm:$0xff]  ;;  %v415_v54 = vld [vmem:[#allocation10 + $0x50] sm:$0xff]  ;;  %v414_v55 = vld [vmem:[#allocation10 + $0x48] sm:$0xff] }
  0x26   :  { %138 = vmatpush.msra.mxu0 %v123_v14  ;;  %304 = vmatpush.msra.mxu2 %v855_v13  ;;  %v413_v56 = vld [vmem:[#allocation10 + $0x40] sm:$0xff]  ;;  %v412_v57 = vld [vmem:[#allocation10 + $0x38] sm:$0xff]  ;;  %v411_v58 = vld [vmem:[#allocation10 + $0x30] sm:$0xff] }
  0x27   :  { %205 = vmatpush.msra.mxu1 %v860_v15  ;;  %230 = vmatpush.msra.mxu3 %v860_v15  ;;  %v410_v59 = vld [vmem:[#allocation10 + $0x28] sm:$0xff]  ;;  %v409_v60 = vld [vmem:[#allocation10 + $0x20] sm:$0xff]  ;;  %v111_v61 = vld [vmem:[#allocation2 + $0x20] sm:$0xff] }
  0x28   :  { %139 = vmatpush.msra.mxu0 %v122_v16  ;;  %305 = vmatpush.msra.mxu2 %v860_v15  ;;  %v408_v62 = vld [vmem:[#allocation10 + $0x18] sm:$0xff]  ;;  %v407_v63 = vld [vmem:[#allocation10 + $0x10] sm:$0xff]  ;;  %v406_v0 = vld [vmem:[#allocation10 + $0x8] sm:$0xff] }
  0x29   :  { %206 = vmatpush.msra.mxu1 %v865_v17  ;;  %231 = vmatpush.msra.mxu3 %v865_v17  ;;  %v405_v1 = vld [vmem:[#allocation10] sm:$0xff]  ;;  %v114_v16 = vld [vmem:[#allocation2 + $0x38] sm:$0xff] }
  0x2a   :  { %140 = vmatpush.msra.mxu0 %v121_v18  ;;  %306 = vmatpush.msra.mxu2 %v865_v17  ;;  %v112_v6 = vld [vmem:[#allocation2 + $0x28] sm:$0xff] }
  0x2b   :  { %207 = vmatpush.msra.mxu1 %v870_v19  ;;  %232 = vmatpush.msra.mxu3 %v870_v19 }
  0x2c   :  { %141 = vmatpush.msra.mxu0 %v120_v20  ;;  %307 = vmatpush.msra.mxu2 %v870_v19 }
  0x2d   :  { %208 = vmatpush.msra.mxu1 %v875_v21  ;;  %233 = vmatpush.msra.mxu3 %v875_v21 }
  0x2e   :  { %142 = vmatpush.msra.mxu0 %v119_v22  ;;  %308 = vmatpush.msra.mxu2 %v875_v21 }
  0x2f   :  { %209 = vmatpush.msra.mxu1 %v880_v23  ;;  %234 = vmatpush.msra.mxu3 %v880_v23 }
  0x30   :  { %143 = vmatpush.msra.mxu0 %v118_v24  ;;  %309 = vmatpush.msra.mxu2 %v880_v23 }
  0x31   :  { %210 = vmatpush.msra.mxu1 %v885_v25  ;;  %235 = vmatpush.msra.mxu3 %v885_v25 }
  0x32   :  { %144 = vmatpush.msra.mxu0 %v117_v26  ;;  %310 = vmatpush.msra.mxu2 %v885_v25 }
  0x33   :  { %211 = vmatpush.msra.mxu1 %v890_v27  ;;  %236 = vmatpush.msra.mxu3 %v890_v27 }
  0x34   :  { %145 = vmatpush.msra.mxu0 %v116_v28  ;;  %311 = vmatpush.msra.mxu2 %v890_v27 }
  0x35   :  { %212 = vmatpush.msra.mxu1 %v895_v29  ;;  %237 = vmatpush.msra.mxu3 %v895_v29 }
  0x36   :  { %146 = vmatpush.msra.mxu0 %v115_v30  ;;  %312 = vmatpush.msra.mxu2 %v895_v29 }
  0x37   :  { %147 = vmatmul.f32.vlgmr.msra.gmra.mxu0 %v107_v31  ;;  %213 = vmatpush.msra.mxu1 %v900_v32 }
  0x38   :  { %214 = vmatmul.f32.vlgmr.msra.gmra.mxu1 %v105_v33  ;;  %238 = vmatpush.msra.mxu3 %v900_v32 }
  0x39   :  { %273 = vmatpush.msrb.mxu1 %v829_v2  ;;  %313 = vmatpush.msra.mxu2 %v900_v32 }
  0x3a   :  { %248 = vmatpush.msrb.mxu3 %v829_v2  ;;  %348 = vmatpush.msrb.mxu0 %v829_v2 }
  0x3b   :  { %274 = vmatpush.msrb.mxu1 %v832_v4  ;;  %421 = vmatpush.msrb.mxu2 %v420_v45 }
  0x3c   :  { %249 = vmatpush.msrb.mxu3 %v832_v4  ;;  %349 = vmatpush.msrb.mxu0 %v832_v4 }
  0x3d   :  { %275 = vmatpush.msrb.mxu1 %v835_v5  ;;  %422 = vmatpush.msrb.mxu2 %v419_v46 }
  0x3e   :  { %250 = vmatpush.msrb.mxu3 %v835_v5  ;;  %350 = vmatpush.msrb.mxu0 %v835_v5 }
  0x3f   :  { %276 = vmatpush.msrb.mxu1 %v840_v7  ;;  %150 = vmatmul.f32.gmra.mxu0 %v108_v34 }
  0x40   :  { %251 = vmatpush.msrb.mxu3 %v840_v7  ;;  %351 = vmatpush.msrb.mxu0 %v840_v7 }
  0x41   :  { %277 = vmatpush.msrb.mxu1 %v845_v9  ;;  %423 = vmatpush.msrb.mxu2 %v418_v47 }
  0x42   :  { %252 = vmatpush.msrb.mxu3 %v845_v9  ;;  %352 = vmatpush.msrb.mxu0 %v845_v9 }
  0x43   :  { %278 = vmatpush.msrb.mxu1 %v850_v11  ;;  %424 = vmatpush.msrb.mxu2 %v417_v52 }
  0x44   :  { %253 = vmatpush.msrb.mxu3 %v850_v11  ;;  %353 = vmatpush.msrb.mxu0 %v850_v11 }
  0x45   :  { %279 = vmatpush.msrb.mxu1 %v855_v13  ;;  %425 = vmatpush.msrb.mxu2 %v416_v53 }
  0x46   :  { %254 = vmatpush.msrb.mxu3 %v855_v13  ;;  %354 = vmatpush.msrb.mxu0 %v855_v13 }
  0x47   :  { %280 = vmatpush.msrb.mxu1 %v860_v15  ;;  %153 = vmatmul.f32.gmra.mxu0 %v109_v39 }
  0x48   :  { %255 = vmatpush.msrb.mxu3 %v860_v15  ;;  %355 = vmatpush.msrb.mxu0 %v860_v15 }
  0x49   :  { %281 = vmatpush.msrb.mxu1 %v865_v17  ;;  %426 = vmatpush.msrb.mxu2 %v415_v54 }
  0x4a   :  { %256 = vmatpush.msrb.mxu3 %v865_v17  ;;  %356 = vmatpush.msrb.mxu0 %v865_v17 }
  0x4b   :  { %282 = vmatpush.msrb.mxu1 %v870_v19  ;;  %427 = vmatpush.msrb.mxu2 %v414_v55 }
  0x4c   :  { %257 = vmatpush.msrb.mxu3 %v870_v19  ;;  %357 = vmatpush.msrb.mxu0 %v870_v19 }
  0x4d   :  { %283 = vmatpush.msrb.mxu1 %v875_v21  ;;  %428 = vmatpush.msrb.mxu2 %v413_v56 }
  0x4e   :  { %258 = vmatpush.msrb.mxu3 %v875_v21  ;;  %358 = vmatpush.msrb.mxu0 %v875_v21 }
  0x4f   :  { %284 = vmatpush.msrb.mxu1 %v880_v23  ;;  %156 = vmatmul.f32.gmra.mxu0 %v110_v44 }
  0x50   :  { %259 = vmatpush.msrb.mxu3 %v880_v23  ;;  %359 = vmatpush.msrb.mxu0 %v880_v23 }
  0x51   :  { %285 = vmatpush.msrb.mxu1 %v885_v25  ;;  %429 = vmatpush.msrb.mxu2 %v412_v57 }
  0x52   :  { %260 = vmatpush.msrb.mxu3 %v885_v25  ;;  %360 = vmatpush.msrb.mxu0 %v885_v25 }
  0x53   :  { %286 = vmatpush.msrb.mxu1 %v890_v27  ;;  %430 = vmatpush.msrb.mxu2 %v411_v58 }
  0x54   :  { %261 = vmatpush.msrb.mxu3 %v890_v27  ;;  %361 = vmatpush.msrb.mxu0 %v890_v27 }
  0x55   :  { %287 = vmatpush.msrb.mxu1 %v895_v29  ;;  %431 = vmatpush.msrb.mxu2 %v410_v59 }
  0x56   :  { %262 = vmatpush.msrb.mxu3 %v895_v29  ;;  %362 = vmatpush.msrb.mxu0 %v895_v29 }
  0x57   :  { %288 = vmatpush.msrb.mxu1 %v900_v32  ;;  %432 = vmatpush.msrb.mxu2 %v409_v60 }
  0x58   :  { %263 = vmatpush.msrb.mxu3 %v900_v32  ;;  %363 = vmatpush.msrb.mxu0 %v900_v32 }
  0x59   :  { %373 = vmatpush.msra.mxu1 %v829_v2  ;;  %159 = vmatmul.f32.gmra.mxu0 %v111_v61 }
  0x5a   :  { %433 = vmatpush.msrb.mxu2 %v408_v62 }
  0x5b   :  { %374 = vmatpush.msra.mxu1 %v832_v4 }
  0x5c   :  { %434 = vmatpush.msrb.mxu2 %v407_v63 }
  0x5d   :  { %375 = vmatpush.msra.mxu1 %v835_v5 }
  0x5e   :  { %435 = vmatpush.msrb.mxu2 %v406_v0 }
  0x5f   :  { %376 = vmatpush.msra.mxu1 %v840_v7 }
  0x60   :  { %436 = vmatpush.msrb.mxu2 %v405_v1 }
  0x61   :  { %377 = vmatpush.msra.mxu1 %v845_v9  ;;  %162 = vmatmul.f32.gmra.mxu0 %v112_v6 }
  0x63   :  { %378 = vmatpush.msra.mxu1 %v850_v11 }
  0x65   :  { %379 = vmatpush.msra.mxu1 %v855_v13 }
  0x67   :  { %380 = vmatpush.msra.mxu1 %v860_v15 }
  0x69   :  { %381 = vmatpush.msra.mxu1 %v865_v17 }
  0x6b   :  { %382 = vmatpush.msra.mxu1 %v870_v19 }
  0x6d   :  { %383 = vmatpush.msra.mxu1 %v875_v21 }
  0x6f   :  { %384 = vmatpush.msra.mxu1 %v880_v23 }
  0x71   :  { %385 = vmatpush.msra.mxu1 %v885_v25 }
  0x73   :  { %386 = vmatpush.msra.mxu1 %v890_v27 }
  0x75   :  { %387 = vmatpush.msra.mxu1 %v895_v29 }
  0x77   :  { %388 = vmatpush.msra.mxu1 %v900_v32 }
  0xb4   :  { %v148_v35 = vpop.f32.mrf.mxu0 }
  0xb5   :  { %v215_v36 = vpop.f32.mrf.mxu1 }
  0xb6   :  { %v218_v37 = vadd.f32 %v215_v36, %v148_v35 }
  0xb8   :  { %534 = vtanh.f32 %v218_v37 }
  0xbc   :  { %v151_v40 = vpop.f32.mrf.mxu0 }
  0xbe   :  { %v973_v38 = vpop.eup %534 }
  0xbf   :  { %220 = vst [vmem:[#allocation12] sm:$0xff] %v973_v38  ;;  %239 = vmatmul.f32.vlgmr.msra.gmra.mxu3 %v973_v38 }
  0xc0   :  { %323 = vmatpush.msra.mxu3 %v829_v2 }
  0xc2   :  { %324 = vmatpush.msra.mxu3 %v832_v4 }
  0xc4   :  { %325 = vmatpush.msra.mxu3 %v835_v5  ;;  %v154_v48 = vpop.f32.mrf.mxu0 }
  0xc6   :  { %326 = vmatpush.msra.mxu3 %v840_v7 }
  0xc8   :  { %327 = vmatpush.msra.mxu3 %v845_v9 }
  0xca   :  { %328 = vmatpush.msra.mxu3 %v850_v11 }
  0xcc   :  { %329 = vmatpush.msra.mxu3 %v855_v13  ;;  %v157_v2 = vpop.f32.mrf.mxu0 }
  0xce   :  { %330 = vmatpush.msra.mxu3 %v860_v15  ;;  %v113_v15 = vld [vmem:[#allocation2 + $0x30] sm:$0xff] }
  0xcf   :  { %165 = vmatmul.f32.gmra.mxu0 %v113_v15 }
  0xd0   :  { %331 = vmatpush.msra.mxu3 %v865_v17 }
  0xd2   :  { %332 = vmatpush.msra.mxu3 %v870_v19 }
  0xd4   :  { %333 = vmatpush.msra.mxu3 %v875_v21 }
  0xd6   :  { %334 = vmatpush.msra.mxu3 %v880_v23  ;;  %v160_v7 = vpop.f32.mrf.mxu0 }
  0xd7   :  { %168 = vmatmul.f32.gmra.mxu0 %v114_v16 }
  0xd8   :  { %335 = vmatpush.msra.mxu3 %v885_v25 }
  0xda   :  { %336 = vmatpush.msra.mxu3 %v890_v27 }
  0xdc   :  { %337 = vmatpush.msra.mxu3 %v895_v29 }
  0xde   :  { %338 = vmatpush.msra.mxu3 %v900_v32  ;;  %v163_v17 = vpop.f32.mrf.mxu0 }
 0x142   :  { %v240_v41 = vpop.f32.mrf.mxu3 }
 0x143   :  { %v243_v42 = vadd.f32 %v240_v41, %v151_v40 }
 0x145   :  { %536 = vtanh.f32 %v243_v42 }
 0x14b   :  { %v537_v43 = vpop.eup %536 }
 0x14c   :  { %245 = vst [vmem:[#allocation12 + $0x8] sm:$0xff] %v537_v43  ;;  %264 = vmatmul.f32.vlgmr.msrb.gmra.mxu3 %v537_v43  ;;  %v166_v22 = vpop.f32.mrf.mxu0 }
 0x154   :  { %v169_v23 = vpop.f32.mrf.mxu0 }
 0x1cf   :  { %v265_v49 = vpop.f32.mrf.mxu3 }
 0x1d0   :  { %v268_v50 = vadd.f32 %v265_v49, %v154_v48 }
 0x1d2   :  { %538 = vtanh.f32 %v268_v50 }
 0x1d8   :  { %v539_v51 = vpop.eup %538 }
 0x1d9   :  { %270 = vst [vmem:[#allocation12 + $0x10] sm:$0xff] %v539_v51  ;;  %289 = vmatmul.f32.vlgmr.msrb.gmra.mxu1 %v539_v51 }
 0x256   :  { %v290_v3 = vpop.f32.mrf.mxu1 }
 0x257   :  { %v293_v4 = vadd.f32 %v290_v3, %v157_v2 }
 0x259   :  { %540 = vtanh.f32 %v293_v4 }
 0x25f   :  { %v541_v5 = vpop.eup %540 }
 0x260   :  { %295 = vst [vmem:[#allocation12 + $0x18] sm:$0xff] %v541_v5  ;;  %314 = vmatmul.f32.vlgmr.msra.gmra.mxu2 %v541_v5 }
 0x268   :  { %437 = vmatmul.f32.vlgmr.msrb.gmra.mxu2 %v973_v38 }
 0x270   :  { %440 = vmatmul.f32.gmra.mxu2 %v537_v43 }
 0x278   :  { %443 = vmatmul.f32.gmra.mxu2 %v539_v51 }
 0x280   :  { %446 = vmatmul.f32.gmra.mxu2 %v541_v5 }
 0x2e3   :  { %v315_v8 = vpop.f32.mrf.mxu2 }
 0x2e4   :  { %v318_v9 = vadd.f32 %v315_v8, %v160_v7 }
 0x2e6   :  { %542 = vtanh.f32 %v318_v9 }
 0x2eb   :  { %v438_v10 = vpop.f32.mrf.mxu2 }
 0x2ec   :  { %v543_v11 = vpop.eup %542  ;;  %462 = vst [vmem:[#allocation11] sm:$0xff] %v438_v10 }
 0x2ed   :  { %320 = vst [vmem:[#allocation12 + $0x20] sm:$0xff] %v543_v11  ;;  %339 = vmatmul.f32.vlgmr.msra.gmra.mxu3 %v543_v11  ;;  %449 = vmatmul.f32.gmra.mxu2 %v543_v11 }
 0x2f3   :  { %v441_v12 = vpop.f32.mrf.mxu2 }
 0x2f4   :  { %463 = vst [vmem:[#allocation11 + $0x8] sm:$0xff] %v441_v12 }
 0x2fb   :  { %v444_v13 = vpop.f32.mrf.mxu2 }
 0x2fc   :  { %464 = vst [vmem:[#allocation11 + $0x10] sm:$0xff] %v444_v13 }
 0x303   :  { %v447_v14 = vpop.f32.mrf.mxu2 }
 0x304   :  { %465 = vst [vmem:[#allocation11 + $0x18] sm:$0xff] %v447_v14 }
 0x370   :  { %v340_v18 = vpop.f32.mrf.mxu3  ;;  %v450_v19 = vpop.f32.mrf.mxu2 }
 0x371   :  { %v343_v20 = vadd.f32 %v340_v18, %v163_v17  ;;  %466 = vst [vmem:[#allocation11 + $0x20] sm:$0xff] %v450_v19 }
 0x373   :  { %544 = vtanh.f32 %v343_v20 }
 0x379   :  { %v545_v21 = vpop.eup %544 }
 0x37a   :  { %345 = vst [vmem:[#allocation12 + $0x28] sm:$0xff] %v545_v21  ;;  %364 = vmatmul.f32.vlgmr.msrb.gmra.mxu0 %v545_v21  ;;  %452 = vmatmul.f32.gmra.mxu2 %v545_v21 }
 0x3f7   :  { %v365_v24 = vpop.f32.mrf.mxu0 }
 0x3f8   :  { %v368_v25 = vadd.f32 %v365_v24, %v166_v22 }
 0x3fa   :  { %546 = vtanh.f32 %v368_v25 }
 0x3fd   :  { %v453_v26 = vpop.f32.mrf.mxu2 }
 0x3fe   :  { %467 = vst [vmem:[#allocation11 + $0x28] sm:$0xff] %v453_v26 }
 0x400   :  { %v547_v27 = vpop.eup %546 }
 0x401   :  { %370 = vst [vmem:[#allocation12 + $0x30] sm:$0xff] %v547_v27  ;;  %389 = vmatmul.f32.vlgmr.msra.gmra.mxu1 %v547_v27  ;;  %455 = vmatmul.f32.gmra.mxu2 %v547_v27 }
 0x47e   :  { %v390_v28 = vpop.f32.mrf.mxu1 }
 0x47f   :  { %v393_v29 = vadd.f32 %v390_v28, %v169_v23 }
 0x481   :  { %548 = vtanh.f32 %v393_v29 }
 0x484   :  { %v456_v30 = vpop.f32.mrf.mxu2 }
 0x485   :  { %468 = vst [vmem:[#allocation11 + $0x30] sm:$0xff] %v456_v30 }
 0x487   :  { %v549_v31 = vpop.eup %548 }
 0x488   :  { %395 = vst [vmem:[#allocation12 + $0x38] sm:$0xff] %v549_v31  ;;  %458 = vmatmul.f32.gmra.mxu2 %v549_v31 }
 0x489   :  { %396 = vst [vmem:[#allocation14] sm:$0xff] %v549_v31  ;;  %495 = dma.vmem_to_hbm [thread:$0]  %s488_s24, 1024, %s490_s27, [#allocation13], %s754_s1, %s754_s1, %s755_s14  }
 0x48a   :  { %506 = dma.vmem_to_hbm [thread:$0]  %s502_s29, 128, %s504_s9, [#allocation13]  }
 0x50b   :  { %v459_v32 = vpop.f32.mrf.mxu2 }
 0x50c   :  { %469 = vst [vmem:[#allocation11 + $0x38] sm:$0xff] %v459_v32 }
 0x50d   :  { %482 = dma.vmem_to_hbm [thread:$0]  %s475_s11, 1024, %s477_s6, [#allocation4], %s754_s1, %s754_s1, %s755_s14  }
 0x50e   :  { %748 = dma.done.wait [#allocation4], 1024  }
 0x50f   :  { %749 = vsyncadd [#allocation4], 4294966272 }
 0x510   :  { %750 = dma.done.wait [#allocation13], 1152  }
 0x511   :  { %751 = vsyncadd [#allocation13], 4294966144 }
 0x512   :  { %519 = vsyncpa [#allocation3], 1 }
 0x513   :  { %520 = vsyncpa [#allocation6], 1 }
 0x514   :  { %521 = vsyncpa [#allocation9], 1 }
 0x515   :  { %522 = vsyncpa [#allocation4], 1 }
 0x516   :  { %523 = vsyncpa [#allocation13], 1 }

</bundles_post_ra>
